<compile_context>
chip_gen: v6e
topology: v6e:2x2x1
jax: 0.10.0
libtpu: 0.0.40
codegen_flags: <defaults>
</compile_context>

<pallas_src>
import functools

import jax
import jax.numpy as jnp
from jax.experimental import pallas as pl
from jax.experimental.pallas import tpu as pltpu


LANES = 128
# (4096, 128) f32 block = 2 MiB; 2 inputs x 2 pipeline buffers = 8 MiB VMEM,
# inside the scoped-VMEM budget on v5e / v6e / v7x while amortizing the
# per-grid-step overhead over ~1.5 us of HBM streaming per step.
MAX_ROW_TILE = 4096


def _bce_ls_kernel(x_ref, t_ref, out_ref, acc_ref, *,
                   smoothing, weight_ratio, n_elem, num_blocks):
    c = pl.program_id(0)            # core-split axis ("parallel")
    i = pl.program_id(1)            # sequential row-block axis ("arbitrary")
    steps = pl.num_programs(1)

    @pl.when(i == 0)
    def _():
        acc_ref[...] = jnp.zeros_like(acc_ref)

    row_tile, lanes = x_ref.shape

    x = x_ref[...].astype(jnp.float32)
    t = t_ref[...].astype(jnp.float32)

    # Label smoothing.
    ts = t * (1.0 - smoothing) + 0.5 * smoothing
    # Numerically-stable BCE-with-logits (matches torch.nn.BCEWithLogitsLoss).
    loss = jnp.maximum(x, 0.0) - x * ts + jnp.log1p(jnp.exp(-jnp.abs(x)))
    # Per-sample weight, folded: w = ratio*ts + (1 - ts) = 1 + (ratio - 1)*ts.
    contrib = loss * (1.0 + (weight_ratio - 1.0) * ts)

    def fold(v):
        # Fold (row_tile, 128) onto the (8, 128) accumulator with elementwise
        # VPU adds only.
        return v.reshape(-1, 8, lanes).sum(axis=0)

    # Only the last logical block (lane pad / partial-edge garbage) and the
    # clamped duplicate blocks that over-range steps of the core split re-read
    # (must not double count) can contain invalid elements.  Interior blocks
    # skip the mask arithmetic entirely.
    logical_block = c * steps + i
    needs_mask = logical_block >= (num_blocks - 1)

    @pl.when(jnp.logical_not(needs_mask))
    def _():
        acc_ref[...] += fold(contrib)

    @pl.when(needs_mask)
    def _():
        # Validity mask over the flattened element index.  Everything above is
        # elementwise, so garbage in invalid positions cannot leak into valid
        # lanes; zeroing it here (before the fold) is sufficient.
        row_ids = jax.lax.broadcasted_iota(jnp.int32, (row_tile, lanes), 0)
        lane_ids = jax.lax.broadcasted_iota(jnp.int32, (row_tile, lanes), 1)
        linear = (logical_block * row_tile + row_ids) * lanes + lane_ids
        acc_ref[...] += fold(jnp.where(linear < n_elem, contrib, 0.0))

    @pl.when(i == steps - 1)
    def _():
        out_ref[...] = acc_ref[...]


def bce_labelsmooth_weighted_loss(inputs, targets,
                                  smoothing=0.2, n_bckg=1.0, n_seiz=0.1):
    """Mean of weighted, label-smoothed BCE-with-logits (scalar float32)."""
    assert inputs.shape == targets.shape
    n_elem = int(inputs.size)

    x = jnp.ravel(inputs)
    t = jnp.ravel(targets)

    # Pad only up to the next lane multiple (no-op for lane-aligned sizes);
    # tiny inputs (< 8 rows) are padded up to one (8, 128) tile.
    pad = (-n_elem) % LANES
    rows = (n_elem + pad) // LANES
    if rows < 8:
        pad = 8 * LANES - n_elem
        rows = 8
    if pad:
        x = jnp.pad(x, (0, pad))
        t = jnp.pad(t, (0, pad))

    x2 = x.reshape(rows, LANES)
    t2 = t.reshape(rows, LANES)

    # Largest legal row tile: multiple of 8, capped at MAX_ROW_TILE.
    row_tile = min(MAX_ROW_TILE, (rows // 8) * 8)
    num_blocks = -(-rows // row_tile)

    # Split row blocks over 2 TensorCores (v7x megacore); degenerates to a
    # serial outer axis on 1-TC chips and to a single core for tiny inputs.
    num_cores = 2 if num_blocks >= 2 else 1
    steps_per_core = -(-num_blocks // num_cores)

    def in_map(c, i):
        # Clamp so over-range steps on the last core re-read a valid block;
        # their contribution is zeroed by the in-kernel mask.
        return (jnp.minimum(c * steps_per_core + i, num_blocks - 1), 0)

    tile_spec = pl.BlockSpec((row_tile, LANES), in_map)
    kernel = functools.partial(
        _bce_ls_kernel,
        smoothing=float(smoothing),
        weight_ratio=float(n_bckg) / float(n_seiz),
        n_elem=n_elem,
        num_blocks=num_blocks,
    )

    partials = pl.pallas_call(
        kernel,
        out_shape=jax.ShapeDtypeStruct((num_cores * 8, LANES), jnp.float32),
        grid_spec=pltpu.PrefetchScalarGridSpec(
            num_scalar_prefetch=0,
            grid=(num_cores, steps_per_core),
            in_specs=[tile_spec, tile_spec],
            out_specs=pl.BlockSpec((8, LANES), lambda c, i: (c, 0)),
            scratch_shapes=[pltpu.VMEM((8, LANES), jnp.float32)],
        ),
        compiler_params=pltpu.CompilerParams(
            dimension_semantics=("parallel", "arbitrary"),
            vmem_limit_bytes=32 * 1024 * 1024),
    )(x2, t2)

    # Final cross-lane reduce + mean divide: cheap glue on (num_cores*8, 128).
    return jnp.sum(partials) / jnp.float32(n_elem)


def _reference(inputs, targets, smoothing=0.2, n_bckg=1.0, n_seiz=0.1):
    t = targets.astype(jnp.float32) * (1.0 - smoothing) + 0.5 * smoothing
    x = inputs.astype(jnp.float32)
    loss = jnp.maximum(x, 0.0) - x * t + jnp.log1p(jnp.exp(-jnp.abs(x)))
    w = (n_bckg / n_seiz) * t + (1.0 - t)
    return jnp.mean(loss * w)


if __name__ == "__main__":
    key = jax.random.PRNGKey(0)
    k1, k2 = jax.random.split(key)

    # Logits and binary targets, NCHW-shaped like a segmentation output.
    x = jax.random.normal(k1, (2, 4, 16, 16), dtype=jnp.float32)
    y = (jax.random.uniform(k2, (2, 4, 16, 16)) > 0.5).astype(jnp.float32)

    out = jax.block_until_ready(bce_labelsmooth_weighted_loss(x, y))
    ref = _reference(x, y)
    assert jnp.allclose(out, ref, rtol=1e-5, atol=1e-5), (out, ref)

    # Non-lane-aligned shape: exercises tail padding + rows<8 path.
    k3, k4 = jax.random.split(k1)
    xs = jax.random.normal(k3, (3, 5, 7), dtype=jnp.float32)
    ys = (jax.random.uniform(k4, (3, 5, 7)) > 0.5).astype(jnp.float32)
    out_s = jax.block_until_ready(bce_labelsmooth_weighted_loss(xs, ys))
    assert jnp.allclose(out_s, _reference(xs, ys), rtol=1e-5, atol=1e-5)

    # Non-tile-aligned row count: exercises the partial-edge-block mask,
    # the unmasked fast path, and the 2-core grid split.
    k5, k6 = jax.random.split(k2)
    xm = jax.random.normal(k5, (4, 100, 7), dtype=jnp.float32)
    ym = (jax.random.uniform(k6, (4, 100, 7)) > 0.5).astype(jnp.float32)
    out_m = jax.block_until_ready(bce_labelsmooth_weighted_loss(xm, ym))
    assert jnp.allclose(out_m, _reference(xm, ym), rtol=1e-5, atol=1e-5)

    # Larger case (> MAX_ROW_TILE rows): exercises the big-tile streaming path
    # with one full unmasked block plus a masked partial edge block.
    k7, k8 = jax.random.split(k3)
    xl = jax.random.normal(k7, (9, 4, 128, 128), dtype=jnp.float32)
    yl = (jax.random.uniform(k8, (9, 4, 128, 128)) > 0.5).astype(jnp.float32)
    out_l = jax.block_until_ready(bce_labelsmooth_weighted_loss(xl, yl))
    assert jnp.allclose(out_l, _reference(xl, yl), rtol=1e-4, atol=1e-6)

    print("KERNEL_OK")
</pallas_src>

<mosaic_0001>
module attributes {stable_mosaic.version = 11 : i64} {
  func.func @_bce_ls_kernel(%arg0: i32, %arg1: i32, %arg2: memref<16x128xf32, #tpu.memory_space<vmem>>, %arg3: memref<16x128xf32, #tpu.memory_space<vmem>>, %arg4: memref<8x128xf32, #tpu.memory_space<vmem>>, %arg5: memref<8x128xf32, #tpu.memory_space<vmem>>) attributes {dimension_semantics = [#tpu.dimension_semantics<parallel>, #tpu.dimension_semantics<arbitrary>], iteration_bounds = array<i64: 1, 1>, scalar_prefetch = 0 : i64, scratch_operands = 1 : i64, tpu.core_type = #tpu.core_type<tc>, window_params = [{transform_indices = @transform_0, window_bounds = array<i64: 16, 128>}, {transform_indices = @transform_1, window_bounds = array<i64: 16, 128>}, {transform_indices = @transform_2, window_bounds = array<i64: 8, 128>}]} {
    %c0_i32 = arith.constant 0 : i32
    %0 = arith.cmpi eq, %arg1, %c0_i32 : i32
    %1 = arith.extui %0 : i1 to i32
    %c0_i32_0 = arith.constant 0 : i32
    %2 = arith.cmpi ne, %1, %c0_i32_0 : i32
    scf.if %2 {
      %cst_14 = arith.constant 0.000000e+00 : f32
      %35 = vector.broadcast %cst_14 : f32 to vector<8x128xf32>
      %c0_15 = arith.constant 0 : index
      %c0_16 = arith.constant 0 : index
      %36 = vector.load %arg5[%c0_15, %c0_16] : memref<8x128xf32, #tpu.memory_space<vmem>>, vector<8x128xf32>
      tpu.vector_store %arg5[%c0_15, %c0_16], %35 {strides = array<i32>} : memref<8x128xf32, #tpu.memory_space<vmem>>, vector<8x128xf32>,
    } else {
    }
    %c0 = arith.constant 0 : index
    %c0_1 = arith.constant 0 : index
    %3 = vector.load %arg2[%c0, %c0_1] : memref<16x128xf32, #tpu.memory_space<vmem>>, vector<16x128xf32>
    %c0_2 = arith.constant 0 : index
    %c0_3 = arith.constant 0 : index
    %4 = vector.load %arg3[%c0_2, %c0_3] : memref<16x128xf32, #tpu.memory_space<vmem>>, vector<16x128xf32>
    %cst = arith.constant 8.000000e-01 : f32
    %5 = vector.broadcast %cst : f32 to vector<16x128xf32>
    %6 = arith.mulf %4, %5 : vector<16x128xf32>
    %cst_4 = arith.constant 1.000000e-01 : f32
    %7 = vector.broadcast %cst_4 : f32 to vector<16x128xf32>
    %8 = arith.addf %6, %7 : vector<16x128xf32>
    %cst_5 = arith.constant 0.000000e+00 : f32
    %9 = vector.broadcast %cst_5 : f32 to vector<16x128xf32>
    %10 = arith.maximumf %3, %9 : vector<16x128xf32>
    %11 = arith.mulf %3, %8 : vector<16x128xf32>
    %12 = arith.subf %10, %11 : vector<16x128xf32>
    %13 = math.absf %3 : vector<16x128xf32>
    %cst_6 = arith.constant 0.000000e+00 : f32
    %14 = vector.broadcast %cst_6 : f32 to vector<16x128xf32>
    %15 = arith.subf %14, %13 : vector<16x128xf32>
    %16 = math.exp %15 : vector<16x128xf32>
    %17 = math.log1p %16 : vector<16x128xf32>
    %18 = arith.addf %12, %17 : vector<16x128xf32>
    %cst_7 = arith.constant 9.000000e+00 : f32
    %19 = vector.broadcast %cst_7 : f32 to vector<16x128xf32>
    %20 = arith.mulf %19, %8 : vector<16x128xf32>
    %cst_8 = arith.constant 1.000000e+00 : f32
    %21 = vector.broadcast %cst_8 : f32 to vector<16x128xf32>
    %22 = arith.addf %21, %20 : vector<16x128xf32>
    %23 = arith.mulf %18, %22 : vector<16x128xf32>
    %c1_i32 = arith.constant 1 : i32
    %24 = arith.muli %arg0, %c1_i32 : i32
    %25 = arith.addi %24, %arg1 : i32
    %c0_i32_9 = arith.constant 0 : i32
    %26 = arith.cmpi sge, %25, %c0_i32_9 : i32
    %true = arith.constant true
    %27 = arith.xori %26, %true : i1
    %28 = arith.extui %27 : i1 to i32
    %c0_i32_10 = arith.constant 0 : i32
    %29 = arith.cmpi ne, %28, %c0_i32_10 : i32
    scf.if %29 {
      %c0_14 = arith.constant 0 : index
      %c0_15 = arith.constant 0 : index
      %35 = vector.load %arg5[%c0_14, %c0_15] : memref<8x128xf32, #tpu.memory_space<vmem>>, vector<8x128xf32>
      %36 = vector.shape_cast %23 : vector<16x128xf32> to vector<2x8x128xf32>
      %cst_16 = arith.constant dense<0.000000e+00> : vector<8x128xf32>
      %37 = vector.multi_reduction <add>, %36, %cst_16 [0] : vector<2x8x128xf32> to vector<8x128xf32>
      %38 = arith.addf %35, %37 : vector<8x128xf32>
      %c0_17 = arith.constant 0 : index
      %c0_18 = arith.constant 0 : index
      %39 = vector.load %arg5[%c0_17, %c0_18] : memref<8x128xf32, #tpu.memory_space<vmem>>, vector<8x128xf32>
      tpu.vector_store %arg5[%c0_17, %c0_18], %38 {strides = array<i32>} : memref<8x128xf32, #tpu.memory_space<vmem>>, vector<8x128xf32>,
    } else {
    }
    %30 = arith.extui %26 : i1 to i32
    %c0_i32_11 = arith.constant 0 : i32
    %31 = arith.cmpi ne, %30, %c0_i32_11 : i32
    scf.if %31 {
      %35 = tpu.iota {dimensions = array<i32: 0>} : vector<16x128xi32>
      %36 = tpu.iota {dimensions = array<i32: 1>} : vector<16x128xi32>
      %c16_i32 = arith.constant 16 : i32
      %37 = arith.muli %25, %c16_i32 : i32
      %38 = vector.broadcast %37 : i32 to vector<16x128xi32>
      %39 = arith.addi %38, %35 : vector<16x128xi32>
      %c128_i32 = arith.constant 128 : i32
      %40 = vector.broadcast %c128_i32 : i32 to vector<16x128xi32>
      %41 = arith.muli %39, %40 : vector<16x128xi32>
      %42 = arith.addi %41, %36 : vector<16x128xi32>
      %c0_14 = arith.constant 0 : index
      %c0_15 = arith.constant 0 : index
      %43 = vector.load %arg5[%c0_14, %c0_15] : memref<8x128xf32, #tpu.memory_space<vmem>>, vector<8x128xf32>
      %c2048_i32 = arith.constant 2048 : i32
      %44 = vector.broadcast %c2048_i32 : i32 to vector<16x128xi32>
      %45 = arith.cmpi slt, %42, %44 : vector<16x128xi32>
      %cst_16 = arith.constant 0.000000e+00 : f32
      %46 = vector.broadcast %cst_16 : f32 to vector<16x128xf32>
      %47 = arith.select %45, %23, %46 : vector<16x128xi1>, vector<16x128xf32>
      %48 = vector.shape_cast %47 : vector<16x128xf32> to vector<2x8x128xf32>
      %cst_17 = arith.constant dense<0.000000e+00> : vector<8x128xf32>
      %49 = vector.multi_reduction <add>, %48, %cst_17 [0] : vector<2x8x128xf32> to vector<8x128xf32>
      %50 = arith.addf %43, %49 : vector<8x128xf32>
      %c0_18 = arith.constant 0 : index
      %c0_19 = arith.constant 0 : index
      %51 = vector.load %arg5[%c0_18, %c0_19] : memref<8x128xf32, #tpu.memory_space<vmem>>, vector<8x128xf32>
      tpu.vector_store %arg5[%c0_18, %c0_19], %50 {strides = array<i32>} : memref<8x128xf32, #tpu.memory_space<vmem>>, vector<8x128xf32>,
    } else {
    }
    %c0_i32_12 = arith.constant 0 : i32
    %32 = arith.cmpi eq, %arg1, %c0_i32_12 : i32
    %33 = arith.extui %32 : i1 to i32
    %c0_i32_13 = arith.constant 0 : i32
    %34 = arith.cmpi ne, %33, %c0_i32_13 : i32
    scf.if %34 {
      %c0_14 = arith.constant 0 : index
      %c0_15 = arith.constant 0 : index
      %35 = vector.load %arg5[%c0_14, %c0_15] : memref<8x128xf32, #tpu.memory_space<vmem>>, vector<8x128xf32>
      %c0_16 = arith.constant 0 : index
      %c0_17 = arith.constant 0 : index
      %36 = vector.load %arg4[%c0_16, %c0_17] : memref<8x128xf32, #tpu.memory_space<vmem>>, vector<8x128xf32>
      tpu.vector_store %arg4[%c0_16, %c0_17], %35 {strides = array<i32>} : memref<8x128xf32, #tpu.memory_space<vmem>>, vector<8x128xf32>,
    } else {
    }
    return
  }
  func.func @transform_0(%arg0: i32, %arg1: i32) -> (i32, i32) {
    %c1_i32 = arith.constant 1 : i32
    %0 = arith.muli %arg0, %c1_i32 : i32
    %1 = arith.addi %0, %arg1 : i32
    %c0_i32 = arith.constant 0 : i32
    %2 = arith.minsi %1, %c0_i32 : i32
    %c0_i32_0 = arith.constant 0 : i32
    %c0_i32_1 = arith.constant 0 : i32
    return %2, %c0_i32_0 : i32, i32
  }
  func.func @transform_1(%arg0: i32, %arg1: i32) -> (i32, i32) {
    %c1_i32 = arith.constant 1 : i32
    %0 = arith.muli %arg0, %c1_i32 : i32
    %1 = arith.addi %0, %arg1 : i32
    %c0_i32 = arith.constant 0 : i32
    %2 = arith.minsi %1, %c0_i32 : i32
    %c0_i32_0 = arith.constant 0 : i32
    %c0_i32_1 = arith.constant 0 : i32
    return %2, %c0_i32_0 : i32, i32
  }
  func.func @transform_2(%arg0: i32, %arg1: i32) -> (i32, i32) {
    %c0_i32 = arith.constant 0 : i32
    %c0_i32_0 = arith.constant 0 : i32
    return %arg0, %c0_i32 : i32, i32
  }
}

</mosaic_0001>

<bundles_post_ra>
// kernel: tpu_custom_call.1
= control target key start
LH: loop header
LB: loop body
LE: loop exit
PB: predicated region body
PF: predicated region fallthrough
CT: control target
= control target key end

     0   :  { %7 = vsyncpa [#allocation4], 0  ;;  %s280_s0 = inlined_call_operand.hbm [shape: f32[16,128], index: 0, kind: input, shape index: {}]   ;;  %s281_s1 = inlined_call_operand.hbm [shape: f32[16,128], index: 1, kind: input, shape index: {}]   ;;  %s282_s2 = inlined_call_operand.hbm [shape: f32[8,128], index: 2, kind: output, shape index: {}]  }
   0x1   :  { %8 = vsyncpa [#allocation7], 0 }
   0x2   :  { %9 = vsyncpa [#allocation5], 0  ;;  %s251_s9 = smov [#allocation3]  }
   0x3   :  { %s21_s10 = sshll.u32 %s251_s9, 4  ;;  %s22_s10 = int_to_ptr.vmem [resolvable:$true] %s21_s10 }
   0x4   :  { %s193_s11 = scalar_lea.vmem %s22_s10, 256  ;;  %p198_p1 = scmp.lt.s32.totalorder %s22_s10, %s22_s10 }
   0x5   :  { %p194_p0 = scmp.ne.s32.totalorder %s22_s10, %s193_s11  ;;  %p199_p2 = scmp.lt.s32.totalorder %s193_s11, %s193_s11 }
   0x7   :  { %p200_p3 = por %p199_p2, %p198_p1 }
   0x9   :  { %p201_p4 = pnand %p200_p3, %p194_p0 }
   0xb   :  { %204 = shalt.err (!%p201_p4)
}
   0xc   :  { %s252_s12 = smov 128   ;;  %s253_s13 = smov 8  }
   0xd   :  { %27 = dma.hbm_to_vmem [thread:$0]  %s280_s0, 256, %s22_s10, [#allocation4], %s252_s12, %s252_s12, %s253_s13  }
   0xe   :  { %s254_s16 = smov [#allocation6]  }
   0xf   :  { %s39_s17 = sshll.u32 %s254_s16, 4  ;;  %s40_s17 = int_to_ptr.vmem [resolvable:$true] %s39_s17 }
  0x10   :  { %s213_s18 = scalar_lea.vmem %s40_s17, 256  ;;  %p218_p6 = scmp.lt.s32.totalorder %s40_s17, %s40_s17 }
  0x11   :  { %p214_p5 = scmp.ne.s32.totalorder %s40_s17, %s213_s18  ;;  %p219_p7 = scmp.lt.s32.totalorder %s213_s18, %s213_s18 }
  0x13   :  { %p220_p8 = por %p219_p7, %p218_p6 }
  0x15   :  { %p221_p9 = pnand %p220_p8, %p214_p5 }
  0x17   :  { %224 = shalt.err (!%p221_p9)
}
  0x18   :  { %45 = dma.hbm_to_vmem [thread:$0]  %s281_s1, 256, %s40_s17, [#allocation7], %s252_s12, %s252_s12, %s253_s13  }
  0x19   :  { %245 = dma.done.wait [#allocation4], 256  }
  0x1a   :  { %246 = vsyncadd [#allocation4], 4294967040 }
  0x1b   :  { %247 = dma.done.wait [#allocation7], 256  }
  0x1c   :  { %248 = vsyncadd [#allocation7], 4294967040  ;;  %v65_v0 = vld [vmem:[#allocation3] sm:$0xff]  ;;  %v66_v1 = vld [vmem:[#allocation3 + $0x8] sm:$0xff]  ;;  %v126_v14 = vlaneseq  ;;  %s255_s0 = smov [#allocation8]  }
  0x1d   :  { %v79_v2 = vand.u32 2147483647, %v65_v0  ;;  %v80_v3 = vand.u32 2147483647, %v66_v1  ;;  %v67_v10 = vld [vmem:[#allocation6] sm:$0xff]  ;;  %v68_v12 = vld [vmem:[#allocation6 + $0x8] sm:$0xff] }
  0x1e   :  { %v69_v15 = vmul.f32 0.8, %v67_v10  ;;  %v70_v16 = vmul.f32 0.8, %v68_v12  ;;  %v127_v17 = vshrl.u32 %v126_v14, 7  ;;  %v130_v24 = vand.u32 127, %v126_v14 }
  0x1f   :  { %v81_v4 = vsub.f32 0.0, %v79_v2  ;;  %v82_v5 = vsub.f32 0.0, %v80_v3  ;;  %v73_v25 = vmax.f32 %v65_v0, 0.0  ;;  %v74_v29 = vmax.f32 %v66_v1, 0.0  ;;  %s158_s1 = sshll.u32 %s255_s0, 4  ;;  %s159_s1 = int_to_ptr.vmem [resolvable:$true] %s158_s1 }
  0x20   :  { %v71_v19 = vadd.f32 0.1, %v69_v15  ;;  %v72_v21 = vadd.f32 0.1, %v70_v16  ;;  %v128_v22 = vadd.s32 8, %v127_v17  ;;  %v135_v32 = vmul.u32 128, %v127_v17  ;;  %p230_p11 = scmp.lt.s32.totalorder %s159_s1, %s159_s1 }
  0x21   :  { %v83_v6 = vmul.f32 1.442695, %v81_v4  ;;  %v85_v7 = vmul.f32 1.442695, %v82_v5  ;;  %s225_s21 = scalar_lea.vmem %s159_s1, 128 }
  0x22   :  { %v75_v26 = vmul.f32 %v71_v19, %v65_v0  ;;  %v76_v30 = vmul.f32 %v72_v21, %v66_v1  ;;  %v107_v33 = vmul.f32 9.0, %v71_v19  ;;  %v136_v34 = vmul.u32 128, %v128_v22  ;;  %p226_p10 = scmp.ne.s32.totalorder %s159_s1, %s225_s21  ;;  %p231_p12 = scmp.lt.s32.totalorder %s225_s21, %s225_s21 }
  0x23   :  { %177 = vpow2.f32 %v83_v6  ;;  %v108_v36 = vmul.f32 9.0, %v72_v21  ;;  %v137_v43 = vadd.s32 %v135_v32, %v130_v24 }
  0x24   :  { %179 = vpow2.f32 %v85_v7  ;;  %v77_v38 = vsub.f32 %v73_v25, %v75_v26  ;;  %v78_v41 = vsub.f32 %v74_v29, %v76_v30  ;;  %v109_v45 = vadd.f32 1.0, %v107_v33  ;;  %p232_p13 = por %p231_p12, %p230_p11 }
  0x25   :  { %v138_v46 = vadd.s32 %v136_v34, %v130_v24  ;;  %v110_v48 = vadd.f32 1.0, %v108_v36  ;;  %vm140_vm2 = vcmp.lt.s32.totalorder %v137_v43, 2048 }
  0x26   :  { %p233_p0 = pnand %p232_p13, %p226_p10 }
  0x27   :  { %vm141_vm3 = vcmp.lt.s32.totalorder %v138_v46, 2048 }
  0x30   :  { %v178_v8 = vpop.eup %177 }
  0x31   :  { %v180_v9 = vpop.eup %179  ;;  %v87_v11 = vadd.f32 1.0, %v178_v8  ;;  %v90_v18 = vmul.f32 -0.5, %v178_v8  ;;  %v93_v27 = vand.u32 2147483647, %v178_v8 }
  0x32   :  { %v96_v13 = vadd.f32 1.0, %v180_v9  ;;  %v99_v20 = vmul.f32 -0.5, %v180_v9  ;;  %v102_v31 = vand.u32 2147483647, %v180_v9 }
  0x33   :  { %181 = vlog2.f32 %v87_v11  ;;  %v91_v23 = vadd.f32 1.0, %v90_v18  ;;  %vm94_vm0 = vcmp.lt.f32.partialorder %v93_v27, 0.0004427343 }
  0x34   :  { %183 = vlog2.f32 %v96_v13  ;;  %v100_v28 = vadd.f32 1.0, %v99_v20  ;;  %vm103_vm1 = vcmp.lt.f32.partialorder %v102_v31, 0.0004427343 }
  0x35   :  { %v92_v35 = vmul.f32 %v178_v8, %v91_v23 }
  0x36   :  { %v101_v39 = vmul.f32 %v180_v9, %v100_v28 }
  0x40   :  { %v182_v37 = vpop.eup %181 }
  0x41   :  { %v184_v40 = vpop.eup %183  ;;  %v89_v42 = vmul.f32 0.6931472, %v182_v37 }
  0x42   :  { %v98_v44 = vmul.f32 0.6931472, %v184_v40 }
  0x43   :  { %v95_v47 = vsel %vm94_vm0, %v92_v35, %v89_v42 }
  0x44   :  { %v104_v49 = vsel %vm103_vm1, %v101_v39, %v98_v44  ;;  %v105_v50 = vadd.f32 %v95_v47, %v77_v38 }
  0x45   :  { %v106_v51 = vadd.f32 %v104_v49, %v78_v41 }
  0x46   :  { %v111_v52 = vmul.f32 %v109_v45, %v105_v50 }
  0x47   :  { %v112_v53 = vmul.f32 %v110_v48, %v106_v51 }
  0x48   :  { %v142_v54 = vsel %vm140_vm2, %v111_v52, 0.0 }
  0x49   :  { %v143_v55 = vsel %vm141_vm3, %v112_v53, 0.0 }
  0x4a   :  { %v144_v56 = vadd.f32 %v143_v55, %v142_v54 }
  0x4c   :  { %151 = vst [vmem:[#allocation8] sm:$0xff] %v144_v56 }
  0x4d   :  { %236 = shalt.err (!%p233_p0)
}
  0x4e   :  { %161 = dma.vmem_to_hbm [thread:$0]  %s159_s1, 128, %s282_s2, [#allocation5]  }
  0x4f   :  { %249 = dma.done.wait [#allocation5], 128  }
  0x50   :  { %250 = vsyncadd [#allocation5], 4294967168 }
  0x51   :  { %165 = vsyncpa [#allocation4], 1 }
  0x52   :  { %166 = vsyncpa [#allocation7], 1 }
  0x53   :  { %167 = vsyncpa [#allocation5], 1 }

</bundles_post_ra>
